<compile_context>
chip_gen: v6e
topology: v6e:2x2x1
jax: 0.10.0
libtpu: 0.0.40
codegen_flags: <defaults>
</compile_context>

<pallas_src>
import jax
import jax.numpy as jnp
from jax import lax
from jax.experimental import pallas as pl
from jax.experimental.pallas import tpu as pltpu
import numpy as np


# ---------------------------------------------------------------------------
# Pallas kernel: one batch element per grid step.
#   x_ref   : (C, L) f32   input slab
#   a_ref   : (C, C) bf16  A = wq.T @ wk   (fused query/key weight)
#   wvg_ref : (C, C) bf16  gamma * wv      (value weight with gamma folded in)
#   o_ref   : (C, L) f32   output slab
# ---------------------------------------------------------------------------
def transformer_kernel(x_ref, a_ref, wvg_ref, o_ref):
    x_f32 = x_ref[...]                          # (C, L) f32, kept for residual add
    x = x_f32.astype(jnp.bfloat16)              # bf16 MXU operand (cast once)

    # key-side projection with fused weight: ax = A @ x -> (C, L), f32 accumulate
    ax = jnp.dot(a_ref[...], x, preferred_element_type=jnp.float32)

    # logits s[l, m] = sum_c x[c, l] * ax[c, m]  == (x.T) @ (A @ x)
    # transpose folded into dot_general (contract dim 0 of both operands)
    s = lax.dot_general(
        x, ax.astype(jnp.bfloat16),
        (((0,), (0,)), ((), ())),
        preferred_element_type=jnp.float32)     # (L, L) f32

    # softmax over torch dim=1 of (B, L, L) == axis 0 of this (L, L) slab.
    # Deferred normalization: keep p unnormalized, scale columns after the matmul.
    m = jnp.max(s, axis=0, keepdims=True)       # (1, L) f32
    p = jnp.exp(s - m)                          # (L, L) f32 (EUP)
    colsum = jnp.sum(p, axis=0, keepdims=True)  # (1, L) f32

    # value projection (gamma already folded into wvg): h = (gamma*wv) @ x -> (C, L)
    h = jnp.dot(wvg_ref[...], x, preferred_element_type=jnp.float32)

    # (h @ p) then per-column normalization (approx EUP reciprocal, broadcast over C)
    hp = jnp.dot(h.astype(jnp.bfloat16), p.astype(jnp.bfloat16),
                 preferred_element_type=jnp.float32)          # (C, L) f32
    inv = pl.reciprocal(colsum, approx=True)                  # (1, L) f32

    o_ref[...] = (hp * inv + x_f32).astype(o_ref.dtype)


@jax.jit
def transformer_forward(x, wq, wk, wv, gamma):
    """x: (B, C, H, W) float32. wq/wk: (C//8, C), wv: (C, C), gamma: (1,). Returns (B, C, H, W)."""
    B, C, H, W = x.shape
    L = H * W
    x2 = x.reshape(B, C, L)

    # Fused, tiny (C x C) weight precomputes; under jit these live in the same XLA
    # program as the pallas_call (no extra eager dispatches):
    #   A   = wq.T @ wk    -> logits become x.T @ (A @ x)
    #   wvg = gamma * wv   -> gamma folded into the value weight
    a_fused = (wq.T @ wk).astype(jnp.bfloat16)
    wv_g = (gamma[0] * wv).astype(jnp.bfloat16)

    out = pl.pallas_call(
        transformer_kernel,
        out_shape=jax.ShapeDtypeStruct((B, C, L), x.dtype),
        grid_spec=pltpu.PrefetchScalarGridSpec(
            num_scalar_prefetch=0,
            grid=(B,),
            in_specs=[
                pl.BlockSpec((None, C, L), lambda b: (b, 0, 0)),  # x slab (batch squeezed)
                pl.BlockSpec((C, C), lambda b: (0, 0)),           # A = wq.T @ wk
                pl.BlockSpec((C, C), lambda b: (0, 0)),           # gamma * wv
            ],
            out_specs=pl.BlockSpec((None, C, L), lambda b: (b, 0, 0)),
        ),
        # Batch axis is independent -> "parallel" (splits across the 2 TCs on v7x).
        compiler_params=pltpu.CompilerParams(
            dimension_semantics=("parallel",)),
    )(x2, a_fused, wv_g)

    return out.reshape(B, C, H, W)


# ---------------------------------------------------------------------------
# Parameter setup (plain JAX glue): deterministic init + spectral normalization
# of each 1x1-conv weight (torch.nn.utils.spectral_norm equivalent: W / sigma_max).
# ---------------------------------------------------------------------------
def spectral_normalize(w, n_iter=30):
    # w: (out, in). Deterministic power iteration for the largest singular value.
    u = jnp.ones((w.shape[0],), w.dtype) / jnp.sqrt(jnp.float32(w.shape[0]))
    for _ in range(n_iter):
        v = w.T @ u
        v = v / (jnp.linalg.norm(v) + 1e-12)
        u = w @ v
        u = u / (jnp.linalg.norm(u) + 1e-12)
    sigma = u @ (w @ v)
    return w / sigma


def reference_forward(x, wq, wk, wv, gamma):
    # Pure-JAX f32 reference of the PyTorch forward (eval mode, mask=None, act='none').
    B, C, H, W = x.shape
    L = H * W
    xf = x.reshape(B, C, L)
    f = jnp.einsum('oc,bcl->bol', wq, xf)
    g = jnp.einsum('oc,bcl->bol', wk, xf)
    h = jnp.einsum('oc,bcl->bol', wv, xf)
    s = jnp.einsum('bcl,bcm->blm', f, g)          # (B, L, L)
    beta = jax.nn.softmax(s, axis=1)              # torch softmax dim=1
    o = gamma[0] * jnp.einsum('bcl,blm->bcm', h, beta) + xf
    return o.reshape(B, C, H, W)


if __name__ == "__main__":
    key = jax.random.PRNGKey(0)
    k_x, k_q, k_k, k_v = jax.random.split(key, 4)

    B, C, H, W = 2, 64, 16, 16          # n_channels = 64 -> query/key project to 64 // 8 = 8
    C8 = C // 8

    x = jax.random.normal(k_x, (B, C, H, W), dtype=jnp.float32)

    wq = spectral_normalize(jax.random.normal(k_q, (C8, C), dtype=jnp.float32) * 0.1)
    wk = spectral_normalize(jax.random.normal(k_k, (C8, C), dtype=jnp.float32) * 0.1)
    wv = spectral_normalize(jax.random.normal(k_v, (C, C), dtype=jnp.float32) * 0.1)
    # PyTorch initializes gamma to 0.0 (output == input); use a nonzero deterministic
    # value here so the attention path is actually exercised.
    gamma = jnp.array([0.5], dtype=jnp.float32)

    out = transformer_forward(x, wq, wk, wv, gamma)
    out = jax.block_until_ready(out)

    ref = reference_forward(x, wq, wk, wv, gamma)
    # Tolerance relaxed vs. the pure-f32 path: the kernel feeds bf16 operands to the MXU
    # (f32 accumulation) and uses an approximate EUP reciprocal for the softmax denom.
    np.testing.assert_allclose(np.asarray(out), np.asarray(ref), rtol=1e-2, atol=1e-2)

    print("KERNEL_OK")
</pallas_src>

<mosaic_0001>
module attributes {stable_mosaic.version = 11 : i64} {
  func.func @transformer_kernel(%arg0: i32, %arg1: memref<1x64x256xf32, #tpu.memory_space<vmem>>, %arg2: memref<64x64xbf16, #tpu.memory_space<vmem>>, %arg3: memref<64x64xbf16, #tpu.memory_space<vmem>>, %arg4: memref<1x64x256xf32, #tpu.memory_space<vmem>>) attributes {dimension_semantics = [#tpu.dimension_semantics<parallel>], iteration_bounds = array<i64: 2>, scalar_prefetch = 0 : i64, scratch_operands = 0 : i64, tpu.core_type = #tpu.core_type<tc>, window_params = [{transform_indices = @transform_0, window_bounds = array<i64: 1, 64, 256>}, {pipeline_mode = #tpu.pipeline_mode<synchronous>, transform_indices = @transform_1, window_bounds = array<i64: 64, 64>}, {pipeline_mode = #tpu.pipeline_mode<synchronous>, transform_indices = @transform_2, window_bounds = array<i64: 64, 64>}, {transform_indices = @transform_3, window_bounds = array<i64: 1, 64, 256>}]} {
    %c0 = arith.constant 0 : index
    %c0_0 = arith.constant 0 : index
    %c0_1 = arith.constant 0 : index
    %0 = vector.load %arg1[%c0, %c0_0, %c0_1] : memref<1x64x256xf32, #tpu.memory_space<vmem>>, vector<1x64x256xf32>
    %1 = vector.shape_cast %0 : vector<1x64x256xf32> to vector<64x256xf32>
    %2 = arith.truncf %1 : vector<64x256xf32> to vector<64x256xbf16>
    %c0_2 = arith.constant 0 : index
    %c0_3 = arith.constant 0 : index
    %3 = vector.load %arg2[%c0_2, %c0_3] : memref<64x64xbf16, #tpu.memory_space<vmem>>, vector<64x64xbf16>
    %cst = arith.constant dense<0.000000e+00> : vector<64x256xf32>
    %4 = tpu.matmul %3, %2, %cst {dimension_numbers = #tpu.dot_dimension_numbers<[1], [0], [0], [1], [0, 0, 1, 1], [], []>} : vector<64x64xbf16>, vector<64x256xbf16>, vector<64x256xf32> -> vector<64x256xf32>
    %5 = arith.truncf %4 : vector<64x256xf32> to vector<64x256xbf16>
    %cst_4 = arith.constant dense<0.000000e+00> : vector<256x256xf32>
    %6 = tpu.matmul %2, %5, %cst_4 {dimension_numbers = #tpu.dot_dimension_numbers<[0], [0], [1], [1], [0, 1, 1, 1], [], []>} : vector<64x256xbf16>, vector<64x256xbf16>, vector<256x256xf32> -> vector<256x256xf32>
    %cst_5 = arith.constant dense<0xFF800000> : vector<256xf32>
    %7 = vector.multi_reduction <maximumf>, %6, %cst_5 [0] : vector<256x256xf32> to vector<256xf32>
    %8 = vector.shape_cast %7 : vector<256xf32> to vector<1x256xf32>
    %9 = vector.broadcast %8 : vector<1x256xf32> to vector<256x256xf32>
    %10 = arith.subf %6, %9 : vector<256x256xf32>
    %11 = math.exp %10 : vector<256x256xf32>
    %cst_6 = arith.constant dense<0.000000e+00> : vector<256xf32>
    %12 = vector.multi_reduction <add>, %11, %cst_6 [0] : vector<256x256xf32> to vector<256xf32>
    %13 = vector.shape_cast %12 : vector<256xf32> to vector<1x256xf32>
    %c0_7 = arith.constant 0 : index
    %c0_8 = arith.constant 0 : index
    %14 = vector.load %arg3[%c0_7, %c0_8] : memref<64x64xbf16, #tpu.memory_space<vmem>>, vector<64x64xbf16>
    %cst_9 = arith.constant dense<0.000000e+00> : vector<64x256xf32>
    %15 = tpu.matmul %14, %2, %cst_9 {dimension_numbers = #tpu.dot_dimension_numbers<[1], [0], [0], [1], [0, 0, 1, 1], [], []>} : vector<64x64xbf16>, vector<64x256xbf16>, vector<64x256xf32> -> vector<64x256xf32>
    %16 = arith.truncf %15 : vector<64x256xf32> to vector<64x256xbf16>
    %17 = arith.truncf %11 : vector<256x256xf32> to vector<256x256xbf16>
    %cst_10 = arith.constant dense<0.000000e+00> : vector<64x256xf32>
    %18 = tpu.matmul %16, %17, %cst_10 {dimension_numbers = #tpu.dot_dimension_numbers<[1], [0], [0], [1], [0, 0, 1, 1], [], []>} : vector<64x256xbf16>, vector<256x256xbf16>, vector<64x256xf32> -> vector<64x256xf32>
    %19 = tpu.reciprocal %13 {approx = true} : vector<1x256xf32> -> vector<1x256xf32>
    %20 = vector.broadcast %19 : vector<1x256xf32> to vector<64x256xf32>
    %21 = arith.mulf %18, %20 : vector<64x256xf32>
    %22 = arith.addf %21, %1 : vector<64x256xf32>
    %c0_11 = arith.constant 0 : index
    %c0_12 = arith.constant 0 : index
    %c0_13 = arith.constant 0 : index
    %23 = vector.load %arg4[%c0_11, %c0_12, %c0_13] : memref<1x64x256xf32, #tpu.memory_space<vmem>>, vector<1x64x256xf32>
    %24 = vector.shape_cast %23 : vector<1x64x256xf32> to vector<64x256xf32>
    %25 = vector.shape_cast %22 : vector<64x256xf32> to vector<1x64x256xf32>
    tpu.vector_store %arg4[%c0_11, %c0_12, %c0_13], %25 {strides = array<i32>} : memref<1x64x256xf32, #tpu.memory_space<vmem>>, vector<1x64x256xf32>,
    return
  }
  func.func @transform_0(%arg0: i32) -> (i32, i32, i32) {
    %c0_i32 = arith.constant 0 : i32
    %c0_i32_0 = arith.constant 0 : i32
    %c0_i32_1 = arith.constant 0 : i32
    return %arg0, %c0_i32, %c0_i32_0 : i32, i32, i32
  }
  func.func @transform_1(%arg0: i32) -> (i32, i32) {
    %c0_i32 = arith.constant 0 : i32
    %c0_i32_0 = arith.constant 0 : i32
    %c0_i32_1 = arith.constant 0 : i32
    return %c0_i32, %c0_i32_0 : i32, i32
  }
  func.func @transform_2(%arg0: i32) -> (i32, i32) {
    %c0_i32 = arith.constant 0 : i32
    %c0_i32_0 = arith.constant 0 : i32
    %c0_i32_1 = arith.constant 0 : i32
    return %c0_i32, %c0_i32_0 : i32, i32
  }
  func.func @transform_3(%arg0: i32) -> (i32, i32, i32) {
    %c0_i32 = arith.constant 0 : i32
    %c0_i32_0 = arith.constant 0 : i32
    %c0_i32_1 = arith.constant 0 : i32
    return %arg0, %c0_i32, %c0_i32_0 : i32, i32, i32
  }
}

</mosaic_0001>

<bundles_post_ra>
// kernel: transformer_forward.1
= control target key start
LH: loop header
LB: loop body
LE: loop exit
PB: predicated region body
PF: predicated region fallthrough
CT: control target
= control target key end

     0   :  { %s1501_s12 = smov 0   ;;  %s2209_s0 = inlined_call_operand.vmem [shape: f32[2,64,256], index: 0, kind: input, shape index: {}]   ;;  %s2210_s1 = inlined_call_operand.vmem [shape: bf16[64,64], index: 1, kind: input, shape index: {}]   ;;  %s2211_s2 = inlined_call_operand.vmem [shape: bf16[64,64], index: 2, kind: input, shape index: {}]   ;;  %s2212_s3 = inlined_call_operand.vmem [shape: f32[2,64,256], index: 3, kind: output, shape index: {}]  }
   0x1 LB: > { %s1262_s13 = sadd.s32 4294967295, %s1478_s12   ;;  %p1266_p0 = scmp.ge.s32.totalorder %s1478_s12, 1  ;;  %s1478_s12 = sphi %s1501_s12, %s13_s12  }
   0x2   : > { %p137_p1 = scmp.lt.s32.totalorder %s1478_s12, 3 }
   0x4   : > { %p138_p2 = pnand %p1266_p0, %p137_p1 }
   0x6   : > { %141 = sbr.rel (%p138_p2) target bundleno = 965 (0x3c5), region = 32 }
   0xb   : > { %p161_p3 = scmp.lt.s32.totalorder %s1262_s13, 1  ;;  %v1480_v0 = vmov 0   ;;  %v1316_v25 = vld [vmem:[%s2210_s1] sm:$0xff]   ;;  %vm224_vm0 = vcmask 523264   ;;  %v1317_v26 = vld [vmem:[%s2210_s1 + $0x8] sm:$0xff]   ;;  %v1318_v27 = vld [vmem:[%s2210_s1 + $0x10] sm:$0xff]  }
   0xc   : > { %269 = vmatprep.mubr.bf16.mxu0 %v1480_v0  ;;  %430 = vmatprep.mubr.bf16.mxu1 %v1480_v0  ;;  %v1319_v28 = vld [vmem:[%s2210_s1 + $0x18] sm:$0xff]  }
   0xd   : > { %s2287_s13 = smov (!%p161_p3, %s1262_s13), 1 }
   0xe   : > { %s1305_s14 = sshll.u32 %s2287_s13, 7 }
   0xf   : > { %s1519_s17 = scalar_lea.vmem %s2209_s0, %s1305_s14  ;;  %s2157_s9 = scalar_lea.vmem %s2212_s3, %s1305_s14 }
  0x10   : > { %v185_v1 = vld [vmem:[%s1519_s17 + $0x68] sm:$0xff]  ;;  %v187_v2 = vld [vmem:[%s1519_s17 + $0x78] sm:$0xff]  ;;  %v184_v3 = vld [vmem:[%s1519_s17 + $0x60] sm:$0xff] }
  0x11   : > { %v195_v4 = vpack.c.bf16 %v187_v2, %v185_v1  ;;  %v186_v5 = vld [vmem:[%s1519_s17 + $0x70] sm:$0xff]  ;;  %v181_v6 = vld [vmem:[%s1519_s17 + $0x48] sm:$0xff]  ;;  %v183_v7 = vld [vmem:[%s1519_s17 + $0x58] sm:$0xff] }
  0x12   : > { %v194_v8 = vpack.c.bf16 %v186_v5, %v184_v3  ;;  %v193_v9 = vpack.c.bf16 %v183_v7, %v181_v6  ;;  %v180_v10 = vld [vmem:[%s1519_s17 + $0x40] sm:$0xff]  ;;  %v182_v11 = vld [vmem:[%s1519_s17 + $0x50] sm:$0xff]  ;;  %v177_v12 = vld [vmem:[%s1519_s17 + $0x28] sm:$0xff] }
  0x13   : > { %245 = vmatprep.subr.bf16.mxu0 %v195_v4  ;;  %v179_v13 = vld [vmem:[%s1519_s17 + $0x38] sm:$0xff]  ;;  %v176_v14 = vld [vmem:[%s1519_s17 + $0x20] sm:$0xff]  ;;  %v178_v15 = vld [vmem:[%s1519_s17 + $0x30] sm:$0xff]  ;;  %v192_v16 = vpack.c.bf16 %v182_v11, %v180_v10 }
  0x14   : > { %246 = vmatpush1.bf16.msra.mxu0 %v194_v8  ;;  %v173_v17 = vld [vmem:[%s1519_s17 + $0x8] sm:$0xff]  ;;  %v175_v18 = vld [vmem:[%s1519_s17 + $0x18] sm:$0xff]  ;;  %v172_v19 = vld [vmem:[%s1519_s17] sm:$0xff]  ;;  %v191_v20 = vpack.c.bf16 %v179_v13, %v177_v12  ;;  %v190_v24 = vpack.c.bf16 %v178_v15, %v176_v14 }
  0x15   : > { %247 = vmatprep.subr.bf16.mxu0 %v193_v9  ;;  %v189_v21 = vpack.c.bf16 %v175_v18, %v173_v17  ;;  %v174_v22 = vld [vmem:[%s1519_s17 + $0x10] sm:$0xff]  ;;  %v1320_v1 = vld [vmem:[%s2211_s2] sm:$0xff]   ;;  %v1321_v3 = vld [vmem:[%s2211_s2 + $0x8] sm:$0xff]  }
  0x16   : > { %v188_v23 = vpack.c.bf16 %v174_v22, %v172_v19  ;;  %v1322_v5 = vld [vmem:[%s2211_s2 + $0x10] sm:$0xff]   ;;  %v1323_v7 = vld [vmem:[%s2211_s2 + $0x18] sm:$0xff]  }
  0x17   : > { %334 = vxpose.xlu1.c.b16.start [1/4] (short) %v189_v21, 128 }
  0x18   : > { %248 = vmatpush1.bf16.msra.mxu0 %v192_v16  ;;  %318 = vxpose.xlu0.c.b16.start [1/4] (short) %v188_v23, 128 }
  0x19   : > { %249 = vmatprep.subr.bf16.mxu0 %v191_v20 }
  0x1b   : > { %335 = vxpose.xlu1.c.b16.cont [2/4] (short) %v191_v20, 128 }
  0x1c   : > { %250 = vmatpush1.bf16.msra.mxu0 %v190_v24  ;;  %319 = vxpose.xlu0.c.b16.cont [2/4] (short) %v190_v24, 128 }
  0x1d   : > { %251 = vmatprep.subr.bf16.mxu0 %v189_v21 }
  0x1f   : > { %336 = vxpose.xlu1.c.b16.cont [3/4] (short) %v193_v9, 128 }
  0x20   : > { %252 = vmatpush1.bf16.msra.mxu0 %v188_v23  ;;  %320 = vxpose.xlu0.c.b16.cont [3/4] (short) %v192_v16, 128 }
  0x21   : > { %979 = vmatprep.subr.bf16.mxu0 %v195_v4 }
  0x23   : > { %1275 = vmatmul.mubr.msk.bf16.vlgmr.msra.gmra.mxu0 %vm224_vm0, %v1316_v25  ;;  %337 = vxpose.xlu1.c.b16.end [4/4] (short) %v195_v4, 128 }
  0x24   : > { %279 = vmatprep.mubr.bf16.mxu0 %v1480_v0  ;;  %321 = vxpose.xlu0.c.b16.end [4/4] (short) %v194_v8, 128 }
  0x25   : > { %980 = vmatpush1.bf16.msra.mxu0 %v194_v8 }
  0x26   : > { %981 = vmatprep.subr.bf16.mxu0 %v193_v9 }
  0x29   : > { %982 = vmatpush1.bf16.msra.mxu0 %v192_v16 }
  0x2a   : > { %983 = vmatprep.subr.bf16.mxu0 %v191_v20 }
  0x2b   : > { %1276 = vmatmul.mubr.msk.bf16.gmra.mxu0 %vm224_vm0, %v1317_v26 }
  0x2c   : > { %289 = vmatprep.mubr.bf16.mxu0 %v1480_v0 }
  0x2d   : > { %984 = vmatpush1.bf16.msra.mxu0 %v190_v24 }
  0x2e   : > { %985 = vmatprep.subr.bf16.mxu0 %v189_v21 }
  0x31   : > { %986 = vmatpush1.bf16.msra.mxu0 %v188_v23 }
  0x33   : > { %1277 = vmatmul.mubr.msk.bf16.gmra.mxu0 %vm224_vm0, %v1318_v27 }
  0x34   : > { %299 = vmatprep.mubr.bf16.mxu0 %v1480_v0 }
  0x3b   : > { %1278 = vmatmul.mubr.msk.bf16.gmra.mxu0 %vm224_vm0, %v1319_v28 }
  0x3c   : > { %1003 = vmatprep.mubr.bf16.mxu0 %v1480_v0 }
  0x43   : > { %1299 = vmatmul.mubr.msk.bf16.vlgmr.msra.gmra.mxu0 %vm224_vm0, %v1320_v1 }
  0x44   : > { %1013 = vmatprep.mubr.bf16.mxu0 %v1480_v0 }
  0x4b   : > { %1300 = vmatmul.mubr.msk.bf16.gmra.mxu0 %vm224_vm0, %v1321_v3 }
  0x4c   : > { %1023 = vmatprep.mubr.bf16.mxu0 %v1480_v0 }
  0x53   : > { %1301 = vmatmul.mubr.msk.bf16.gmra.mxu0 %vm224_vm0, %v1322_v5 }
  0x54   : > { %1033 = vmatprep.mubr.bf16.mxu0 %v1480_v0 }
  0x5b   : > { %1302 = vmatmul.mubr.msk.bf16.gmra.mxu0 %vm224_vm0, %v1323_v7 }
  0x79   : > { %v342_v61 = vpop.trf.xlu1 }
  0x7a   : > { %v326_v53 = vpop.trf.xlu0 }
  0x7d   : > { %v343_v62 = vpop.trf.xlu1 }
  0x7e   : > { %v327_v54 = vpop.trf.xlu0 }
  0x81   : > { %v344_v63 = vpop.trf.xlu1 }
  0x82   : > { %v328_v55 = vpop.trf.xlu0 }
  0x85   : > { %v345_v2 = vpop.trf.xlu1 }
  0x86   : > { %v329_v56 = vpop.trf.xlu0 }
  0x89   : > { %v346_v4 = vpop.trf.xlu1 }
  0x8a   : > { %v330_v57 = vpop.trf.xlu0 }
  0x8d   : > { %v347_v6 = vpop.trf.xlu1 }
  0x8e   : > { %v331_v58 = vpop.trf.xlu0 }
  0x91   : > { %v348_v8 = vpop.trf.xlu1 }
  0x92   : > { %v332_v59 = vpop.trf.xlu0 }
  0x95   : > { %v349_v9 = vpop.trf.xlu1 }
  0x96   : > { %v333_v60 = vpop.trf.xlu0 }
  0xe3   : > { %v271_v29 = vpop.f32.mrf.mxu0 }
  0xe5   : > { %v273_v30 = vpop.f32.mrf.mxu0 }
  0xe7   : > { %v275_v31 = vpop.f32.mrf.mxu0 }
  0xe8   : > { %v310_v52 = vpack.c.bf16 %v275_v31, %v271_v29 }
  0xe9   : > { %v277_v32 = vpop.f32.mrf.mxu0 }
  0xea   : > { %v311_v51 = vpack.c.bf16 %v277_v32, %v273_v30 }
  0xeb   : > { %v281_v33 = vpop.f32.mrf.mxu0 }
  0xed   : > { %v283_v34 = vpop.f32.mrf.mxu0 }
  0xef   : > { %v285_v35 = vpop.f32.mrf.mxu0 }
  0xf0   : > { %v312_v50 = vpack.c.bf16 %v285_v35, %v281_v33 }
  0xf1   : > { %v287_v36 = vpop.f32.mrf.mxu0 }
  0xf2   : > { %v313_v49 = vpack.c.bf16 %v287_v36, %v283_v34 }
  0xf3   : > { %v291_v37 = vpop.f32.mrf.mxu0 }
  0xf5   : > { %v293_v38 = vpop.f32.mrf.mxu0 }
  0xf7   : > { %v295_v39 = vpop.f32.mrf.mxu0 }
  0xf8   : > { %v314_v48 = vpack.c.bf16 %v295_v39, %v291_v37 }
  0xf9   : > { %v297_v40 = vpop.f32.mrf.mxu0 }
  0xfa   : > { %v315_v47 = vpack.c.bf16 %v297_v40, %v293_v38 }
  0xfb   : > { %v301_v41 = vpop.f32.mrf.mxu0 }
  0xfd   : > { %v303_v42 = vpop.f32.mrf.mxu0 }
  0xff   : > { %v305_v43 = vpop.f32.mrf.mxu0 }
 0x100   : > { %v316_v46 = vpack.c.bf16 %v305_v43, %v301_v41 }
 0x101   : > { %v307_v44 = vpop.f32.mrf.mxu0 }
 0x102   : > { %v317_v45 = vpack.c.bf16 %v307_v44, %v303_v42 }
 0x104   : > { %406 = vmatprep.subr.bf16.mxu1 %v317_v45 }
 0x105   : > { %407 = vmatpush1.bf16.msra.mxu1 %v316_v46 }
 0x106   : > { %408 = vmatprep.subr.bf16.mxu1 %v315_v47 }
 0x109   : > { %409 = vmatpush1.bf16.msra.mxu1 %v314_v48 }
 0x10a   : > { %410 = vmatprep.subr.bf16.mxu1 %v313_v49 }
 0x10d   : > { %411 = vmatpush1.bf16.msra.mxu1 %v312_v50 }
 0x10e   : > { %412 = vmatprep.subr.bf16.mxu1 %v311_v51 }
 0x111   : > { %413 = vmatpush1.bf16.msra.mxu1 %v310_v52 }
 0x114   : > { %1279 = vmatmul.mubr.msk.bf16.vlgmr.msra.gmra.mxu1 %vm224_vm0, %v326_v53 }
 0x115   : > { %440 = vmatprep.mubr.bf16.mxu1 %v1480_v0 }
 0x11c   : > { %1280 = vmatmul.mubr.msk.bf16.gmra.mxu1 %vm224_vm0, %v327_v54 }
 0x11d   : > { %450 = vmatprep.mubr.bf16.mxu1 %v1480_v0 }
 0x124   : > { %1281 = vmatmul.mubr.msk.bf16.gmra.mxu1 %vm224_vm0, %v328_v55 }
 0x125   : > { %460 = vmatprep.mubr.bf16.mxu1 %v1480_v0 }
 0x12c   : > { %1282 = vmatmul.mubr.msk.bf16.gmra.mxu1 %vm224_vm0, %v329_v56 }
 0x12d   : > { %470 = vmatprep.mubr.bf16.mxu1 %v1480_v0 }
 0x134   : > { %1283 = vmatmul.mubr.msk.bf16.gmra.mxu1 %vm224_vm0, %v330_v57 }
 0x135   : > { %480 = vmatprep.mubr.bf16.mxu1 %v1480_v0 }
 0x13c   : > { %1284 = vmatmul.mubr.msk.bf16.gmra.mxu1 %vm224_vm0, %v331_v58 }
 0x13d   : > { %490 = vmatprep.mubr.bf16.mxu1 %v1480_v0 }
 0x144   : > { %1285 = vmatmul.mubr.msk.bf16.gmra.mxu1 %vm224_vm0, %v332_v59 }
 0x145   : > { %500 = vmatprep.mubr.bf16.mxu1 %v1480_v0 }
 0x14c   : > { %1286 = vmatmul.mubr.msk.bf16.gmra.mxu1 %vm224_vm0, %v333_v60 }
 0x14d   : > { %510 = vmatprep.mubr.bf16.mxu1 %v1480_v0 }
 0x154   : > { %1287 = vmatmul.mubr.msk.bf16.gmra.mxu1 %vm224_vm0, %v342_v61 }
 0x155   : > { %520 = vmatprep.mubr.bf16.mxu1 %v1480_v0 }
 0x15c   : > { %1288 = vmatmul.mubr.msk.bf16.gmra.mxu1 %vm224_vm0, %v343_v62 }
 0x15d   : > { %530 = vmatprep.mubr.bf16.mxu1 %v1480_v0 }
 0x164   : > { %1289 = vmatmul.mubr.msk.bf16.gmra.mxu1 %vm224_vm0, %v344_v63 }
 0x165   : > { %540 = vmatprep.mubr.bf16.mxu1 %v1480_v0 }
 0x16c   : > { %1290 = vmatmul.mubr.msk.bf16.gmra.mxu1 %vm224_vm0, %v345_v2 }
 0x16d   : > { %550 = vmatprep.mubr.bf16.mxu1 %v1480_v0 }
 0x174   : > { %1291 = vmatmul.mubr.msk.bf16.gmra.mxu1 %vm224_vm0, %v346_v4 }
 0x175   : > { %560 = vmatprep.mubr.bf16.mxu1 %v1480_v0 }
 0x17c   : > { %1292 = vmatmul.mubr.msk.bf16.gmra.mxu1 %vm224_vm0, %v347_v6 }
 0x17d   : > { %570 = vmatprep.mubr.bf16.mxu1 %v1480_v0 }
 0x184   : > { %1293 = vmatmul.mubr.msk.bf16.gmra.mxu1 %vm224_vm0, %v348_v8 }
 0x185   : > { %580 = vmatprep.mubr.bf16.mxu1 %v1480_v0 }
 0x18c   : > { %1294 = vmatmul.mubr.msk.bf16.gmra.mxu1 %vm224_vm0, %v349_v9 }
 0x1d4   : > { %v1607_v10 = vpop.f32.mrf.mxu1 }
 0x1d6   : > { %v1609_v11 = vpop.f32.mrf.mxu1 }
 0x1d8   : > { %v1611_v12 = vpop.f32.mrf.mxu1 }
 0x1da   : > { %v1613_v13 = vpop.f32.mrf.mxu1 }
 0x1dc   : > { %v1615_v14 = vpop.f32.mrf.mxu1 }
 0x1dd   : > { %v591_v58 = vmax.f32 %v1607_v10, %v1615_v14 }
 0x1de   : > { %v1617_v15 = vpop.f32.mrf.mxu1 }
 0x1e0   : > { %v1619_v16 = vpop.f32.mrf.mxu1 }
 0x1e1   : > { %v592_v59 = vmax.f32 %v1611_v12, %v1619_v16 }
 0x1e2   : > { %v1621_v17 = vpop.f32.mrf.mxu1 }
 0x1e3   : > { %2236 = vst [vmem:[#allocation2_spill] sm:$0xff] %v1621_v17 }
 0x1e4   : > { %v1623_v0 = vpop.f32.mrf.mxu1 }
 0x1e5   : > { %v593_v61 = vmax.f32 %v591_v58, %v1623_v0 }
 0x1e6   : > { %v1625_v18 = vpop.f32.mrf.mxu1 }
 0x1e8   : > { %v1627_v19 = vpop.f32.mrf.mxu1 }
 0x1e9   : > { %v594_v62 = vmax.f32 %v592_v59, %v1627_v19 }
 0x1ea   : > { %v1629_v20 = vpop.f32.mrf.mxu1 }
 0x1eb   : > { %2237 = vst [vmem:[#allocation3_spill] sm:$0xff] %v1629_v20 }
 0x1ec   : > { %v1631_v21 = vpop.f32.mrf.mxu1 }
 0x1ed   : > { %v595_v1 = vmax.f32 %v593_v61, %v1631_v21 }
 0x1ee   : > { %v1633_v22 = vpop.f32.mrf.mxu1 }
 0x1f0   : > { %v1635_v23 = vpop.f32.mrf.mxu1 }
 0x1f1   : > { %v596_v2 = vmax.f32 %v594_v62, %v1635_v23 }
 0x1f2   : > { %v1637_v24 = vpop.f32.mrf.mxu1 }
 0x1f3   : > { %2238 = vst [vmem:[#allocation4_spill] sm:$0xff] %v1637_v24 }
 0x1f4   : > { %v1639_v25 = vpop.f32.mrf.mxu1 }
 0x1f5   : > { %2239 = vst [vmem:[#allocation5_spill] sm:$0xff] %v1639_v25  ;;  %v597_v4 = vmax.f32 %v595_v1, %v1639_v25 }
 0x1f6   : > { %v1641_v26 = vpop.f32.mrf.mxu1 }
 0x1f7   : > { %2240 = vst [vmem:[#allocation6_spill] sm:$0xff] %v1641_v26 }
 0x1f8   : > { %v1643_v27 = vpop.f32.mrf.mxu1 }
 0x1f9   : > { %v598_v5 = vmax.f32 %v596_v2, %v1643_v27 }
 0x1fa   : > { %v1645_v28 = vpop.f32.mrf.mxu1 }
 0x1fb   : > { %2241 = vst [vmem:[#allocation7_spill] sm:$0xff] %v1645_v28 }
 0x1fc   : > { %v1647_v29 = vpop.f32.mrf.mxu1 }
 0x1fd   : > { %2242 = vst [vmem:[#allocation8_spill] sm:$0xff] %v1647_v29  ;;  %v599_v7 = vmax.f32 %v597_v4, %v1647_v29 }
 0x1fe   : > { %v1649_v30 = vpop.f32.mrf.mxu1 }
 0x200   : > { %v1651_v31 = vpop.f32.mrf.mxu1 }
 0x201   : > { %v600_v8 = vmax.f32 %v598_v5, %v1651_v31 }
 0x202   : > { %v1653_v32 = vpop.f32.mrf.mxu1 }
 0x204   : > { %v1655_v33 = vpop.f32.mrf.mxu1 }
 0x205   : > { %2243 = vst [vmem:[#allocation9_spill] sm:$0xff] %v1655_v33  ;;  %v601_v58 = vmax.f32 %v599_v7, %v1655_v33 }
 0x206   : > { %v1657_v34 = vpop.f32.mrf.mxu1 }
 0x208   : > { %v1659_v35 = vpop.f32.mrf.mxu1 }
 0x209   : > { %v602_v59 = vmax.f32 %v600_v8, %v1659_v35  ;;  %v629_v8 = vmax.f32 %v1613_v13, %v1621_v17 }
 0x20a   : > { %v1661_v36 = vpop.f32.mrf.mxu1 }
 0x20c   : > { %v1663_v37 = vpop.f32.mrf.mxu1 }
 0x20d   : > { %v603_v62 = vmax.f32 %v601_v58, %v1663_v37 }
 0x20e   : > { %v1665_v38 = vpop.f32.mrf.mxu1 }
 0x210   : > { %v1667_v39 = vpop.f32.mrf.mxu1 }
 0x211   : > { %2244 = vst [vmem:[#allocation10_spill] sm:$0xff] %v1667_v39  ;;  %v604_v1 = vmax.f32 %v602_v59, %v1667_v39 }
 0x212   : > { %v1669_v40 = vpop.f32.mrf.mxu1 }
 0x214   : > { %v1671_v41 = vpop.f32.mrf.mxu1 }
 0x215   : > { %v605_v2 = vmax.f32 %v603_v62, %v1671_v41  ;;  %v628_v62 = vmax.f32 %v1609_v11, %v1617_v15 }
 0x216   : > { %v1673_v42 = vpop.f32.mrf.mxu1 }
 0x218   : > { %v1675_v43 = vpop.f32.mrf.mxu1 }
 0x219   : > { %v606_v4 = vmax.f32 %v604_v1, %v1675_v43  ;;  %v631_v1 = vmax.f32 %v629_v8, %v1629_v20 }
 0x21a   : > { %v1677_v44 = vpop.f32.mrf.mxu1 }
 0x21b   : > { %v633_v17 = vmax.f32 %v631_v1, %v1637_v24 }
 0x21c   : > { %v1679_v45 = vpop.f32.mrf.mxu1 }
 0x21d   : > { %2245 = vst [vmem:[#allocation11_spill] sm:$0xff] %v1679_v45  ;;  %v607_v5 = vmax.f32 %v605_v2, %v1679_v45  ;;  %v630_v45 = vmax.f32 %v628_v62, %v1625_v18  ;;  %v635_v8 = vmax.f32 %v633_v17, %v1645_v28 }
 0x21e   : > { %v1681_v46 = vpop.f32.mrf.mxu1 }
 0x21f   : > { %v637_v1 = vmax.f32 %v635_v8, %v1653_v32 }
 0x220   : > { %v1683_v47 = vpop.f32.mrf.mxu1 }
 0x221   : > { %2246 = vst [vmem:[#allocation12_spill] sm:$0xff] %v1683_v47  ;;  %v608_v7 = vmax.f32 %v606_v4, %v1683_v47  ;;  %v639_v17 = vmax.f32 %v637_v1, %v1661_v36 }
 0x222   : > { %v1685_v48 = vpop.f32.mrf.mxu1 }
 0x224   : > { %v1687_v49 = vpop.f32.mrf.mxu1 }
 0x225   : > { %2247 = vst [vmem:[#allocation13_spill] sm:$0xff] %v1687_v49  ;;  %v609_v58 = vmax.f32 %v607_v5, %v1687_v49  ;;  %v632_v49 = vmax.f32 %v630_v45, %v1633_v22 }
 0x226   : > { %v1689_v50 = vpop.f32.mrf.mxu1 }
 0x227   : > { %v634_v62 = vmax.f32 %v632_v49, %v1641_v26  ;;  %v641_v49 = vmax.f32 %v639_v17, %v1669_v40 }
 0x228   : > { %v1691_v51 = vpop.f32.mrf.mxu1 }
 0x229   : > { %2248 = vst [vmem:[#allocation14_spill] sm:$0xff] %v1691_v51  ;;  %v610_v59 = vmax.f32 %v608_v7, %v1691_v51  ;;  %v636_v45 = vmax.f32 %v634_v62, %v1649_v30 }
 0x22a   : > { %v1693_v52 = vpop.f32.mrf.mxu1 }
 0x22b   : > { %v638_v28 = vmax.f32 %v636_v45, %v1657_v34 }
 0x22c   : > { %v1695_v53 = vpop.f32.mrf.mxu1 }
 0x22d   : > { %v611_v2 = vmax.f32 %v609_v58, %v1695_v53  ;;  %v640_v8 = vmax.f32 %v638_v28, %v1665_v38 }
 0x22e   : > { %v1697_v54 = vpop.f32.mrf.mxu1 }
 0x230   : > { %v1699_v55 = vpop.f32.mrf.mxu1 }
 0x231   : > { %v612_v4 = vmax.f32 %v610_v59, %v1699_v55 }
 0x232   : > { %v1701_v56 = vpop.f32.mrf.mxu1 }
 0x234   : > { %v1703_v57 = vpop.f32.mrf.mxu1 }
 0x235   : > { %v613_v5 = vmax.f32 %v611_v2, %v1703_v57 }
 0x236   : > { %v1709_v60 = vpop.f32.mrf.mxu1 }
 0x238   : > { %v1713_v63 = vpop.f32.mrf.mxu1 }
 0x239   : > { %v614_v7 = vmax.f32 %v612_v4, %v1713_v63 }
 0x23a   : > { %v1717_v3 = vpop.f32.mrf.mxu1 }
 0x23c   : > { %v1721_v6 = vpop.f32.mrf.mxu1 }
 0x23d   : > { %v615_v58 = vmax.f32 %v613_v5, %v1721_v6 }
 0x23e   : > { %v1725_v9 = vpop.f32.mrf.mxu1 }
 0x240   : > { %v1729_v61 = vpop.f32.mrf.mxu1 }
 0x241   : > { %v616_v59 = vmax.f32 %v614_v7, %v1729_v61 }
 0x242   : > { %v1733_v25 = vpop.f32.mrf.mxu1 }
 0x244   : > { %v1737_v29 = vpop.f32.mrf.mxu1 }
 0x245   : > { %2249 = vst [vmem:[#allocation15_spill] sm:$0xff] %v1737_v29  ;;  %v617_v2 = vmax.f32 %v615_v58, %v1737_v29  ;;  %v643_v58 = vmax.f32 %v641_v49, %v1677_v44 }
 0x246   : > { %v1741_v33 = vpop.f32.mrf.mxu1 }
 0x247   : > { %v645_v62 = vmax.f32 %v643_v58, %v1685_v48 }
 0x248   : > { %v1747_v39 = vpop.f32.mrf.mxu1 }
 0x249   : > { %2250 = vst [vmem:[#allocation16_spill] sm:$0xff] %v1747_v39  ;;  %v618_v4 = vmax.f32 %v616_v59, %v1747_v39  ;;  %v642_v39 = vmax.f32 %v640_v8, %v1673_v42 }
 0x24a   : > { %v1754_v47 = vpop.f32.mrf.mxu1 }
 0x24b   : > { %v644_v1 = vmax.f32 %v642_v39, %v1681_v46 }
 0x24c   : > { %v1760_v51 = vpop.f32.mrf.mxu1 }
 0x24d   : > { %v619_v5 = vmax.f32 %v617_v2, %v1760_v51  ;;  %v647_v2 = vmax.f32 %v645_v62, %v1693_v52  ;;  %v646_v45 = vmax.f32 %v644_v1, %v1689_v50 }
 0x24e   : > { %v1766_v20 = vpop.f32.mrf.mxu1 }
 0x24f   : > { %v649_v17 = vmax.f32 %v647_v2, %v1701_v56  ;;  %v648_v28 = vmax.f32 %v646_v45, %v1697_v54  ;;  %v1800_v2 = vpop.f32.mrf.mxu0 }
 0x250   : > { %v1772_v24 = vpop.f32.mrf.mxu1  ;;  %2251 = vst [vmem:[#allocation17_spill] sm:$0xff] %v1800_v2 }
 0x251   : > { %v620_v7 = vmax.f32 %v618_v4, %v1772_v24  ;;  %v650_v8 = vmax.f32 %v648_v28, %v1709_v60 }
 0x253   : > { %v621_v26 = vmax.f32 %v619_v5, %v620_v7  ;;  %v651_v7 = vmax.f32 %v649_v17, %v1717_v3  ;;  %v652_v39 = vmax.f32 %v650_v8, %v1725_v9 }
 0x255   : > { %v622_v59 = vrot.slane %v621_v26, 4  ;;  %v653_v58 = vmax.f32 %v651_v7, %v1733_v25  ;;  %v654_v1 = vmax.f32 %v652_v39, %v1741_v33  ;;  %v1809_v7 = vpop.f32.mrf.mxu0 }
 0x257   : > { %v623_v29 = vmax.f32 %v621_v26, %v622_v59  ;;  %v1792_v26 = vpop.f32.mrf.mxu1  ;;  %v655_v59 = vmax.f32 %v653_v58, %v1754_v47  ;;  %v1813_v39 = vpop.f32.mrf.mxu0 }
 0x258   : > { %2252 = vst [vmem:[#allocation18_spill] sm:$0xff] %v1813_v39 }
 0x259   : > { %v624_v4 = vrot.slane %v623_v29, 2 }
 0x25b   : > { %v625_v5 = vmax.f32 %v623_v29, %v624_v4  ;;  %v657_v29 = vmax.f32 %v655_v59, %v1792_v26  ;;  %v656_v4 = vmax.f32 %v654_v1, %v1766_v20 }
 0x25d   : > { %v626_v49 = vrot.slane %v625_v5, 1 }
 0x25f   : > { %v1796_v62 = vmax.f32 %v625_v5, %v626_v49  ;;  %v658_v5 = vmax.f32 %v656_v4, %v657_v29 }
 0x261   : > { %v665_v45 = vsub.f32 %v1607_v10, %v1796_v62  ;;  %v667_v17 = vsub.f32 %v1611_v12, %v1796_v62  ;;  %v669_v28 = vsub.f32 %v1615_v14, %v1796_v62  ;;  %v671_v49 = vsub.f32 %v1619_v16, %v1796_v62 }
 0x262   : > { %v673_v59 = vsub.f32 %v1623_v0, %v1796_v62  ;;  %v659_v1 = vrot.slane %v658_v5, 4  ;;  %v675_v14 = vsub.f32 %v1627_v19, %v1796_v62  ;;  %v677_v16 = vsub.f32 %v1631_v21, %v1796_v62 }
 0x263   : > { %v729_v8 = vmul.f32 1.442695, %v665_v45  ;;  %v733_v58 = vmul.f32 1.442695, %v667_v17  ;;  %v737_v10 = vmul.f32 1.442695, %v669_v28  ;;  %v679_v0 = vsub.f32 %v1635_v23, %v1796_v62 }
 0x264   : > { %v741_v29 = vmul.f32 1.442695, %v671_v49  ;;  %v745_v4 = vmul.f32 1.442695, %v673_v59  ;;  %v660_v45 = vmax.f32 %v658_v5, %v659_v1  ;;  %v749_v17 = vmul.f32 1.442695, %v675_v14 }
 0x265   : > { %1324 = vpow2.f32 %v729_v8  ;;  %v2253_v28 = vld [vmem:[#allocation5_spill] sm:$0xff]  ;;  %v753_v12 = vmul.f32 1.442695, %v677_v16  ;;  %v683_v19 = vsub.f32 %v1643_v27, %v1796_v62  ;;  %v757_v59 = vmul.f32 1.442695, %v679_v0 }
 0x266   : > { %1326 = vpow2.f32 %v733_v58  ;;  %v681_v8 = vsub.f32 %v2253_v28, %v1796_v62  ;;  %v661_v49 = vrot.slane %v660_v45, 2  ;;  %v2254_v58 = vld [vmem:[#allocation8_spill] sm:$0xff]  ;;  %v687_v5 = vsub.f32 %v1651_v31, %v1796_v62  ;;  %v2255_v23 = vld [vmem:[#allocation9_spill] sm:$0xff] }
 0x267   : > { %1328 = vpow2.f32 %v737_v10  ;;  %v685_v21 = vsub.f32 %v2254_v58, %v1796_v62  ;;  %v689_v10 = vsub.f32 %v2255_v23, %v1796_v62  ;;  %v691_v14 = vsub.f32 %v1659_v35, %v1796_v62 }
 0x268   : > { %1330 = vpow2.f32 %v741_v29  ;;  %v761_v1 = vmul.f32 1.442695, %v681_v8  ;;  %v765_v29 = vmul.f32 1.442695, %v683_v19  ;;  %v662_v16 = vmax.f32 %v660_v45, %v661_v49 }
 0x269   : > { %1332 = vpow2.f32 %v745_v4  ;;  %v693_v4 = vsub.f32 %v1663_v37, %v1796_v62  ;;  %v769_v0 = vmul.f32 1.442695, %v685_v21  ;;  %v709_v31 = vsub.f32 %v1695_v53, %v1796_v62 }
 0x26a   : > { %1334 = vpow2.f32 %v749_v17  ;;  %v773_v28 = vmul.f32 1.442695, %v687_v5  ;;  %v777_v35 = vmul.f32 1.442695, %v689_v10  ;;  %v713_v37 = vsub.f32 %v1703_v57, %v1796_v62 }
 0x26b   : > { %1336 = vpow2.f32 %v753_v12  ;;  %v711_v12 = vsub.f32 %v1699_v55, %v1796_v62  ;;  %v781_v19 = vmul.f32 1.442695, %v691_v14  ;;  %v663_v49 = vrot.slane %v662_v16, 1 }
 0x26c   : > { %1338 = vpow2.f32 %v757_v59  ;;  %v715_v53 = vsub.f32 %v1713_v63, %v1796_v62  ;;  %v785_v58 = vmul.f32 1.442695, %v693_v4  ;;  %v717_v59 = vsub.f32 %v1721_v6, %v1796_v62  ;;  %v2257_v63 = vld [vmem:[#allocation10_spill] sm:$0xff] }
 0x26d   : > { %1340 = vpow2.f32 %v761_v1  ;;  %v817_v5 = vmul.f32 1.442695, %v709_v31  ;;  %v719_v57 = vsub.f32 %v1729_v61, %v1796_v62  ;;  %v821_v23 = vmul.f32 1.442695, %v711_v12 }
 0x26e   : > { %1342 = vpow2.f32 %v765_v29  ;;  %v695_v14 = vsub.f32 %v2257_v63, %v1796_v62  ;;  %v825_v29 = vmul.f32 1.442695, %v713_v37  ;;  %v1867_v4 = vmax.f32 %v662_v16, %v663_v49 }
 0x26f   : > { %1344 = vpow2.f32 %v769_v0  ;;  %v697_v6 = vsub.f32 %v1671_v41, %v1796_v62  ;;  %v829_v0 = vmul.f32 1.442695, %v715_v53  ;;  %v833_v12 = vmul.f32 1.442695, %v717_v59  ;;  %v2259_v59 = vld [vmem:[#allocation12_spill] sm:$0xff] }
 0x270   : > { %1346 = vpow2.f32 %v773_v28  ;;  %v699_v28 = vsub.f32 %v1675_v43, %v1796_v62  ;;  %v837_v16 = vmul.f32 1.442695, %v719_v57  ;;  %v789_v41 = vmul.f32 1.442695, %v695_v14  ;;  %v2260_v14 = vld [vmem:[#allocation13_spill] sm:$0xff] }
 0x271   : > { %1348 = vpow2.f32 %v777_v35  ;;  %v2258_v35 = vld [vmem:[#allocation11_spill] sm:$0xff]  ;;  %v666_v49 = vsub.f32 %v1609_v11, %v1867_v4  ;;  %v793_v53 = vmul.f32 1.442695, %v697_v6  ;;  %v670_v11 = vsub.f32 %v1617_v15, %v1867_v4  ;;  %v2262_v15 = vld [vmem:[#allocation14_spill] sm:$0xff] }
 0x272   : > { %v1837_v27 = vpop.eup %1324  ;;  %1350 = vpow2.f32 %v781_v19  ;;  %v797_v57 = vmul.f32 1.442695, %v699_v28 }
 0x273   : > { %v1841_v17 = vpop.eup %1326  ;;  %1352 = vpow2.f32 %v785_v58  ;;  %v668_v58 = vsub.f32 %v1613_v13, %v1867_v4  ;;  %v731_v13 = vmul.f32 1.442695, %v666_v49  ;;  %v674_v49 = vsub.f32 %v1625_v18, %v1867_v4 }
 0x274   : > { %2256 = vst [vmem:[#allocation5_spill] sm:$0xff] %v1841_v17  ;;  %v857_v45 = vadd.f32 %v1841_v17, %v1837_v27  ;;  %v1849_v8 = vpop.eup %1328  ;;  %1354 = vpow2.f32 %v817_v5  ;;  %v703_v5 = vsub.f32 %v2259_v59, %v1796_v62 }
 0x275   : > { %v1856_v21 = vpop.eup %1330  ;;  %1356 = vpow2.f32 %v821_v23 }
 0x276   : > { %v858_v55 = vadd.f32 %v1849_v8, %v857_v45  ;;  %v1863_v1 = vpop.eup %1332  ;;  %v701_v45 = vsub.f32 %v2258_v35, %v1796_v62  ;;  %1358 = vpow2.f32 %v825_v29  ;;  %v705_v29 = vsub.f32 %v2260_v14, %v1796_v62 }
 0x277   : > { %v1872_v31 = vpop.eup %1334  ;;  %1360 = vpow2.f32 %v829_v0 }
 0x278   : > { %v859_v10 = vadd.f32 %v1856_v21, %v858_v55  ;;  %v1879_v19 = vpop.eup %1336  ;;  %1362 = vpow2.f32 %v833_v12  ;;  %v801_v23 = vmul.f32 1.442695, %v701_v45  ;;  %v735_v12 = vmul.f32 1.442695, %v668_v58  ;;  %v2263_v58 = vld [vmem:[#allocation3_spill] sm:$0xff] }
 0x279   : > { %v1886_v55 = vpop.eup %1338  ;;  %1364 = vpow2.f32 %v837_v16  ;;  %v707_v45 = vsub.f32 %v2262_v15, %v1796_v62  ;;  %v805_v16 = vmul.f32 1.442695, %v703_v5  ;;  %v809_v59 = vmul.f32 1.442695, %v705_v29  ;;  %v2265_v15 = vld [vmem:[#allocation6_spill] sm:$0xff] }
 0x27a   : > { %v860_v61 = vadd.f32 %v1863_v1, %v859_v10  ;;  %v1893_v63 = vpop.eup %1340  ;;  %1366 = vpow2.f32 %v789_v41 }
 0x27b   : > { %v1897_v6 = vpop.eup %1342  ;;  %1368 = vpow2.f32 %v793_v53  ;;  %v739_v53 = vmul.f32 1.442695, %v670_v11  ;;  %v813_v18 = vmul.f32 1.442695, %v707_v45  ;;  %v2264_v11 = vld [vmem:[#allocation4_spill] sm:$0xff]  ;;  %v692_v45 = vsub.f32 %v1661_v36, %v1867_v4 }
 0x27c   : > { %v861_v37 = vadd.f32 %v1872_v31, %v860_v61  ;;  %v2261_v61 = vld [vmem:[#allocation2_spill] sm:$0xff]  ;;  %v1902_v35 = vpop.eup %1344  ;;  %1370 = vpow2.f32 %v797_v57  ;;  %v678_v57 = vsub.f32 %v1633_v22, %v1867_v4  ;;  %v680_v29 = vsub.f32 %v2264_v11, %v1867_v4 }
 0x27d   : > { %v672_v28 = vsub.f32 %v2261_v61, %v1867_v4  ;;  %1372 = vpow2.f32 %v801_v23  ;;  %v690_v22 = vsub.f32 %v1657_v34, %v1867_v4  ;;  %v696_v36 = vsub.f32 %v1669_v40, %v1867_v4 }
 0x27e   : > { %v862_v43 = vadd.f32 %v1879_v19, %v861_v37  ;;  %v1906_v37 = vpop.eup %1346  ;;  %1374 = vpow2.f32 %v731_v13  ;;  %v682_v13 = vsub.f32 %v2265_v15, %v1867_v4 }
 0x27f   : > { %1376 = vpow2.f32 %v735_v12  ;;  %v743_v23 = vmul.f32 1.442695, %v672_v28  ;;  %v747_v28 = vmul.f32 1.442695, %v674_v49  ;;  %v694_v49 = vsub.f32 %v1665_v38, %v1867_v4 }
 0x280   : > { %v863_v10 = vadd.f32 %v1886_v55, %v862_v43  ;;  %v1911_v43 = vpop.eup %1348  ;;  %1378 = vpow2.f32 %v805_v16  ;;  %v779_v38 = vmul.f32 1.442695, %v690_v22 }
 0x281   : > { %v1915_v14 = vpop.eup %1350  ;;  %1380 = vpow2.f32 %v739_v53 }
 0x282   : > { %v864_v0 = vadd.f32 %v1893_v63, %v863_v10  ;;  %v676_v10 = vsub.f32 %v2263_v58, %v1867_v4  ;;  %v1920_v61 = vpop.eup %1352  ;;  %1382 = vpow2.f32 %v809_v59  ;;  %v759_v59 = vmul.f32 1.442695, %v680_v29 }
 0x283   : > { %v1926_v58 = vpop.eup %1354  ;;  %1384 = vpow2.f32 %v743_v23  ;;  %v783_v29 = vmul.f32 1.442695, %v692_v45 }
 0x284   : > { %v865_v41 = vadd.f32 %v1897_v6, %v864_v0  ;;  %v1011_v0 = vpop.f32.mrf.mxu0  ;;  %v1931_v12 = vpop.eup %1356  ;;  %v751_v16 = vmul.f32 1.442695, %v676_v10  ;;  %1386 = vpow2.f32 %v813_v18  ;;  %v2266_v18 = vld [vmem:[#allocation7_spill] sm:$0xff] }
 0x285   : > { %v1045_v11 = vpack.c.bf16 %v1011_v0, %v1809_v7  ;;  %v1936_v2 = vpop.eup %1358  ;;  %1388 = vpow2.f32 %v747_v28 }
 0x286   : > { %v866_v5 = vadd.f32 %v1902_v35, %v865_v41  ;;  %v1941_v53 = vpop.eup %1360  ;;  %1390 = vpow2.f32 %v751_v16  ;;  %v688_v16 = vsub.f32 %v1653_v32, %v1867_v4 }
 0x287   : > { %1116 = vmatprep.mubr.bf16.mxu0 %v1045_v11  ;;  %v1947_v7 = vpop.eup %1362  ;;  %v686_v11 = vsub.f32 %v1649_v30, %v1867_v4 }
 0x288   : > { %v867_v41 = vadd.f32 %v1906_v37, %v866_v5  ;;  %v755_v5 = vmul.f32 1.442695, %v678_v57  ;;  %v763_v57 = vmul.f32 1.442695, %v682_v13  ;;  %v1952_v0 = vpop.eup %1364 }
 0x289   : > { %v1956_v34 = vpop.eup %1366 }
 0x28a   : > { %v868_v15 = vadd.f32 %v1911_v43, %v867_v41  ;;  %v684_v41 = vsub.f32 %v2266_v18, %v1867_v4  ;;  %1392 = vpow2.f32 %v755_v5  ;;  %v1961_v13 = vpop.eup %1368  ;;  %v791_v5 = vmul.f32 1.442695, %v696_v36 }
 0x28b   : > { %2267 = vst [vmem:[#allocation8_spill] sm:$0xff] %v1961_v13  ;;  %1394 = vpow2.f32 %v759_v59  ;;  %v1965_v23 = vpop.eup %1370  ;;  %v775_v36 = vmul.f32 1.442695, %v688_v16 }
 0x28c   : > { %v869_v10 = vadd.f32 %v1915_v14, %v868_v15  ;;  %v787_v15 = vmul.f32 1.442695, %v694_v49  ;;  %2268 = vst [vmem:[#allocation9_spill] sm:$0xff] %v1965_v23  ;;  %1396 = vpow2.f32 %v763_v57  ;;  %v1970_v45 = vpop.eup %1372  ;;  %v767_v28 = vmul.f32 1.442695, %v684_v41  ;;  %v2270_v49 = vld [vmem:[#allocation15_spill] sm:$0xff] }
 0x28d   : > { %2269 = vst [vmem:[#allocation10_spill] sm:$0xff] %v1970_v45  ;;  %1398 = vpow2.f32 %v779_v38  ;;  %v721_v59 = vsub.f32 %v2270_v49, %v1796_v62  ;;  %v2272_v41 = vld [vmem:[#allocation16_spill] sm:$0xff]  ;;  %v718_v49 = vsub.f32 %v1725_v9, %v1867_v4 }
 0x28e   : > { %v870_v40 = vadd.f32 %v1920_v61, %v869_v10  ;;  %v1972_v10 = vpop.eup %1374  ;;  %1400 = vpow2.f32 %v783_v29  ;;  %v723_v29 = vsub.f32 %v2272_v41, %v1796_v62 }
 0x28f   : > { %v1975_v30 = vpop.eup %1376  ;;  %1402 = vpow2.f32 %v787_v15 }
 0x290   : > { %v871_v22 = vadd.f32 %v1956_v34, %v870_v40  ;;  %v771_v40 = vmul.f32 1.442695, %v686_v11  ;;  %v1979_v39 = vpop.eup %1378  ;;  %1404 = vpow2.f32 %v791_v5  ;;  %v894_v57 = vadd.f32 %v1975_v30, %v1972_v10 }
 0x291   : > { %2271 = vst [vmem:[#allocation11_spill] sm:$0xff] %v1979_v39  ;;  %v1984_v38 = vpop.eup %1380  ;;  %v725_v11 = vsub.f32 %v1760_v51, %v1796_v62  ;;  %1406 = vpow2.f32 %v767_v28  ;;  %v841_v5 = vmul.f32 1.442695, %v721_v59  ;;  %v727_v59 = vsub.f32 %v1772_v24, %v1796_v62 }
 0x292   : > { %v872_v18 = vadd.f32 %v1961_v13, %v871_v22  ;;  %v1988_v22 = vpop.eup %1382  ;;  %1408 = vpow2.f32 %v771_v40  ;;  %v720_v13 = vsub.f32 %v1733_v25, %v1867_v4  ;;  %v698_v25 = vsub.f32 %v1673_v42, %v1867_v4 }
 0x293   : > { %v1994_v16 = vpop.eup %1384  ;;  %1410 = vpow2.f32 %v775_v36  ;;  %v849_v9 = vmul.f32 1.442695, %v725_v11  ;;  %v835_v36 = vmul.f32 1.442695, %v718_v49  ;;  %v700_v62 = vsub.f32 %v1677_v44, %v1867_v4 }
 0x294   : > { %v873_v32 = vadd.f32 %v1965_v23, %v872_v18  ;;  %v895_v18 = vadd.f32 %v1984_v38, %v894_v57  ;;  %v1998_v23 = vpop.eup %1386  ;;  %1412 = vpow2.f32 %v841_v5  ;;  %v702_v5 = vsub.f32 %v1681_v46, %v1867_v4 }
 0x295   : > { %2273 = vst [vmem:[#allocation12_spill] sm:$0xff] %v1998_v23  ;;  %v2004_v28 = vpop.eup %1388 }
 0x296   : > { %v874_v15 = vadd.f32 %v1970_v45, %v873_v32  ;;  %v896_v51 = vadd.f32 %v1994_v16, %v895_v18  ;;  %v845_v32 = vmul.f32 1.442695, %v723_v29  ;;  %v2006_v57 = vpop.eup %1390 }
 0x298   : > { %v875_v41 = vadd.f32 %v1979_v39, %v874_v15  ;;  %v897_v45 = vadd.f32 %v2004_v28, %v896_v51  ;;  %v2012_v15 = vpop.eup %1392  ;;  %v839_v39 = vmul.f32 1.442695, %v720_v13  ;;  %1414 = vpow2.f32 %v845_v32 }
 0x299   : > { %v2016_v18 = vpop.eup %1394  ;;  %1416 = vpow2.f32 %v849_v9  ;;  %v795_v32 = vmul.f32 1.442695, %v698_v25  ;;  %v799_v9 = vmul.f32 1.442695, %v700_v62  ;;  %v803_v25 = vmul.f32 1.442695, %v702_v5 }
 0x29a   : > { %v876_v40 = vadd.f32 %v1988_v22, %v875_v41  ;;  %v898_v17 = vadd.f32 %v2006_v57, %v897_v45  ;;  %v2020_v24 = vpop.eup %1396  ;;  %v853_v41 = vmul.f32 1.442695, %v727_v59  ;;  %1418 = vpow2.f32 %v835_v36 }
 0x29b   : > { %v1399_v11 = vpop.eup %1398  ;;  %1420 = vpow2.f32 %v839_v39  ;;  %v704_v59 = vsub.f32 %v1685_v48, %v1867_v4  ;;  %v706_v39 = vsub.f32 %v1689_v50, %v1867_v4 }
 0x29c   : > { %v877_v29 = vadd.f32 %v1998_v23, %v876_v40  ;;  %v899_v49 = vadd.f32 %v2012_v15, %v898_v17  ;;  %v1401_v51 = vpop.eup %1400  ;;  %1422 = vpow2.f32 %v853_v41  ;;  %v710_v23 = vsub.f32 %v1697_v54, %v1867_v4 }
 0x29d   : > { %v2028_v13 = vpop.eup %1402  ;;  %1424 = vpow2.f32 %v795_v32  ;;  %v1065_v41 = vpack.c.bf16 %v1401_v51, %v1399_v11  ;;  %v807_v5 = vmul.f32 1.442695, %v704_v59  ;;  %v728_v32 = vsub.f32 %v1792_v26, %v1867_v4 }
 0x29e   : > { %v878_v42 = vadd.f32 %v1926_v58, %v877_v29  ;;  %v900_v44 = vadd.f32 %v2016_v18, %v899_v49  ;;  %v2032_v40 = vpop.eup %1404  ;;  %1426 = vpow2.f32 %v799_v9  ;;  %v712_v59 = vsub.f32 %v1701_v56, %v1867_v4 }
 0x29f   : > { %v1067_v36 = vpack.c.bf16 %v2032_v40, %v2028_v13  ;;  %v1407_v29 = vpop.eup %1406  ;;  %1428 = vpow2.f32 %v803_v25  ;;  %v722_v26 = vsub.f32 %v1741_v33, %v1867_v4  ;;  %v724_v56 = vsub.f32 %v1754_v47, %v1867_v4 }
 0x2a0   : > { %v879_v45 = vadd.f32 %v1931_v12, %v878_v42  ;;  %v901_v46 = vadd.f32 %v2020_v24, %v900_v44  ;;  %v1066_v42 = vpack.c.bf16 %v1956_v34, %v1920_v61  ;;  %v1409_v49 = vpop.eup %1408  ;;  %v708_v44 = vsub.f32 %v1693_v52, %v1867_v4 }
 0x2a1   : > { %1084 = vmatprep.subr.bf16.mxu0 %v1067_v36  ;;  %v726_v34 = vsub.f32 %v1766_v20, %v1867_v4  ;;  %v1064_v52 = vpack.c.bf16 %v1915_v14, %v1911_v43  ;;  %v714_v20 = vsub.f32 %v1709_v60, %v1867_v4  ;;  %1430 = vpow2.f32 %v807_v5 }
 0x2a2   : > { %v880_v17 = vadd.f32 %v1936_v2, %v879_v45  ;;  %v902_v62 = vadd.f32 %v1407_v29, %v901_v46  ;;  %v1411_v45 = vpop.eup %1410  ;;  %1085 = vmatpush1.bf16.msra.mxu0 %v1066_v42  ;;  %v815_v9 = vmul.f32 1.442695, %v708_v44  ;;  %v819_v14 = vmul.f32 1.442695, %v710_v23 }
 0x2a3   : > { %1086 = vmatprep.subr.bf16.mxu0 %v1065_v41  ;;  %v1063_v36 = vpack.c.bf16 %v1411_v45, %v1409_v49  ;;  %v2057_v42 = vpop.eup %1412  ;;  %v855_v60 = vmul.f32 1.442695, %v728_v32  ;;  %v1062_v33 = vpack.c.bf16 %v1906_v37, %v1902_v35  ;;  %v1061_v23 = vpack.c.bf16 %v1407_v29, %v2020_v24 }
 0x2a4   : > { %v881_v48 = vadd.f32 %v1941_v53, %v880_v17  ;;  %v903_v61 = vadd.f32 %v1409_v49, %v902_v62  ;;  %v811_v17 = vmul.f32 1.442695, %v706_v39  ;;  %v716_v44 = vsub.f32 %v1717_v3, %v1867_v4 }
 0x2a5   : > { %v2065_v39 = vpop.eup %1414  ;;  %v823_v47 = vmul.f32 1.442695, %v712_v59  ;;  %v843_v24 = vmul.f32 1.442695, %v722_v26  ;;  %v847_v29 = vmul.f32 1.442695, %v724_v56  ;;  %v1060_v3 = vpack.c.bf16 %v1897_v6, %v1893_v63 }
 0x2a6   : > { %v882_v50 = vadd.f32 %v1947_v7, %v881_v48  ;;  %v904_v54 = vadd.f32 %v1411_v45, %v903_v61  ;;  %1087 = vmatpush1.bf16.msra.mxu0 %v1064_v52  ;;  %v2068_v49 = vpop.eup %1416  ;;  %v851_v48 = vmul.f32 1.442695, %v726_v34  ;;  %1432 = vpow2.f32 %v811_v17 }
 0x2a7   : > { %1088 = vmatprep.subr.bf16.mxu0 %v1063_v36  ;;  %v2074_v62 = vpop.eup %1418  ;;  %1434 = vpow2.f32 %v815_v9  ;;  %v1059_v34 = vpack.c.bf16 %v2016_v18, %v2012_v15  ;;  %v831_v32 = vmul.f32 1.442695, %v716_v44  ;;  %v1058_v63 = vpack.c.bf16 %v1886_v55, %v1879_v19 }
 0x2a8   : > { %v883_v46 = vadd.f32 %v1952_v0, %v882_v50  ;;  %v905_v25 = vadd.f32 %v1399_v11, %v904_v54  ;;  %v2078_v11 = vpop.eup %1420  ;;  %v827_v50 = vmul.f32 1.442695, %v714_v20  ;;  %1436 = vpow2.f32 %v819_v14 }
 0x2a9   : > { %v1079_v37 = vpack.c.bf16 %v2078_v11, %v2074_v62  ;;  %1438 = vpow2.f32 %v851_v48  ;;  %v1057_v15 = vpack.c.bf16 %v2006_v57, %v2004_v28  ;;  %v1056_v54 = vpack.c.bf16 %v1872_v31, %v1863_v1 }
 0x2aa   : > { %v884_v43 = vadd.f32 %v2057_v42, %v883_v46  ;;  %v906_v45 = vadd.f32 %v1401_v51, %v905_v25  ;;  %1089 = vmatpush1.bf16.msra.mxu0 %v1062_v33  ;;  %v1423_v51 = vpop.eup %1422  ;;  %1440 = vpow2.f32 %v855_v60  ;;  %v1055_v19 = vpack.c.bf16 %v1994_v16, %v1984_v38  ;;  %v2274_v16 = vld [vmem:[#allocation5_spill] sm:$0xff] }
 0x2ab   : > { %1090 = vmatprep.subr.bf16.mxu0 %v1061_v23  ;;  %1442 = vpow2.f32 %v823_v47  ;;  %v1054_v57 = vpack.c.bf16 %v1856_v21, %v1849_v8  ;;  %v1052_v25 = vpack.c.bf16 %v2274_v16, %v1837_v27  ;;  %v1015_v21 = vpop.f32.mrf.mxu0  ;;  %v1080_v27 = vpack.c.bf16 %v2065_v39, %v2057_v42 }
 0x2ac   : > { %v885_v41 = vadd.f32 %v2065_v39, %v884_v43  ;;  %v907_v35 = vadd.f32 %v2028_v13, %v906_v45  ;;  %v2093_v13 = vpop.eup %1424  ;;  %1444 = vpow2.f32 %v827_v50  ;;  %v1053_v43 = vpack.c.bf16 %v1975_v30, %v1972_v10 }
 0x2ad   : > { %v2096_v52 = vpop.eup %1426  ;;  %1446 = vpow2.f32 %v843_v24  ;;  %v1082_v10 = vpack.c.bf16 %v1423_v51, %v2068_v49  ;;  %v1017_v44 = vpop.f32.mrf.mxu0  ;;  %v2276_v39 = vpack.c.bf16 %v1941_v53, %v1936_v2  ;;  %v2280_v2 = vld [vmem:[#allocation11_spill] sm:$0xff] }
 0x2ae   : > { %v886_v5 = vadd.f32 %v2068_v49, %v885_v41  ;;  %v908_v61 = vadd.f32 %v2032_v40, %v907_v35  ;;  %1091 = vmatpush1.bf16.msra.mxu0 %v1060_v3  ;;  %1448 = vpow2.f32 %v847_v29  ;;  %v2103_v18 = vpop.eup %1428 }
 0x2af   : > { %1092 = vmatprep.subr.bf16.mxu0 %v1059_v34  ;;  %1450 = vpow2.f32 %v831_v32  ;;  %v1431_v46 = vpop.eup %1430 }
 0x2b0   : > { %v2088_v4 = vadd.f32 %v1423_v51, %v886_v5  ;;  %v909_v17 = vadd.f32 %v2093_v13, %v908_v61  ;;  %v1019_v5 = vpop.f32.mrf.mxu0  ;;  %v2275_v51 = vpack.c.bf16 %v1952_v0, %v1947_v7  ;;  %v2278_v7 = vld [vmem:[#allocation12_spill] sm:$0xff]  ;;  %v1071_v34 = vpack.c.bf16 %v1431_v46, %v2103_v18 }
 0x2b1   : > { %v1072_v0 = vpack.c.bf16 %v2278_v7, %v1988_v22 }
 0x2b2   : > { %v910_v6 = vadd.f32 %v2096_v52, %v909_v17  ;;  %1093 = vmatpush1.bf16.msra.mxu0 %v1058_v63  ;;  %v1021_v29 = vpop.f32.mrf.mxu0  ;;  %v2279_v17 = vld [vmem:[#allocation10_spill] sm:$0xff]  ;;  %v1069_v63 = vpack.c.bf16 %v2096_v52, %v2093_v13 }
 0x2b3   : > { %1094 = vmatprep.subr.bf16.mxu0 %v1057_v15  ;;  %v1433_v55 = vpop.eup %1432  ;;  %v1070_v53 = vpack.c.bf16 %v2280_v2, %v2279_v17 }
 0x2b4   : > { %v911_v40 = vadd.f32 %v2103_v18, %v910_v6  ;;  %v1435_v59 = vpop.eup %1434  ;;  %v1025_v61 = vpop.f32.mrf.mxu0  ;;  %v2282_v6 = vld [vmem:[#allocation9_spill] sm:$0xff] }
 0x2b5   : > { %v1437_v28 = vpop.eup %1436  ;;  %v2284_v18 = vld [vmem:[#allocation17_spill] sm:$0xff] }
 0x2b6   : > { %v912_v36 = vadd.f32 %v1431_v46, %v911_v40  ;;  %1095 = vmatpush1.bf16.msra.mxu0 %v1056_v54  ;;  %v1439_v26 = vpop.eup %1438  ;;  %v1047_v40 = vpack.c.bf16 %v1021_v29, %v1017_v44  ;;  %v2283_v54 = vld [vmem:[#allocation18_spill] sm:$0xff] }
 0x2b7   : > { %1096 = vmatprep.subr.bf16.mxu0 %v1055_v19  ;;  %v1441_v14 = vpop.eup %1440  ;;  %v2285_v46 = vpack.c.bf16 %v2283_v54, %v2284_v18  ;;  %v1465_v54 = vld [vmem:[%s1519_s17 + $0x48] sm:$0xff] }
 0x2b8   : > { %v913_v20 = vadd.f32 %v1433_v55, %v912_v36  ;;  %v1443_v1 = vpop.eup %1442  ;;  %v1083_v60 = vpack.c.bf16 %v1441_v14, %v1439_v26 }
 0x2b9   : > { %v1445_v38 = vpop.eup %1444  ;;  %v1075_v42 = vpack.c.bf16 %v1443_v1, %v1437_v28 }
 0x2ba   : > { %v914_v9 = vadd.f32 %v1435_v59, %v913_v20  ;;  %1097 = vmatpush1.bf16.msra.mxu0 %v1054_v57  ;;  %v1447_v56 = vpop.eup %1446  ;;  %v888_v57 = vrot.slane %v2088_v4, 4 }
 0x2bb   : > { %1098 = vmatprep.subr.bf16.mxu0 %v1053_v43  ;;  %v1449_v33 = vpop.eup %1448 }
 0x2bc   : > { %v915_v31 = vadd.f32 %v1437_v28, %v914_v9  ;;  %v1451_v41 = vpop.eup %1450  ;;  %v1081_v45 = vpack.c.bf16 %v1449_v33, %v1447_v56  ;;  %v889_v9 = vadd.f32 %v888_v57, %v2088_v4 }
 0x2bd   : > { %v1077_v35 = vpack.c.bf16 %v1451_v41, %v1445_v38 }
 0x2be   : > { %v916_v48 = vadd.f32 %v1443_v1, %v915_v31  ;;  %1099 = vmatpush1.bf16.msra.mxu0 %v1052_v25 }
 0x2bf   : > { %1100 = vmatprep.subr.bf16.mxu0 %v1083_v60 }
 0x2c0   : > { %v917_v8 = vadd.f32 %v1445_v38, %v916_v48 }
 0x2c2   : > { %v918_v30 = vadd.f32 %v1451_v41, %v917_v8  ;;  %1101 = vmatpush2.bf16.msra.mxu0 %v1082_v10  ;;  %v1456_v41 = vld [vmem:[%s1519_s17] sm:$0xff] }
 0x2c3   : > { %1102 = vmatprep.subr.bf16.mxu0 %v1081_v45 }
 0x2c4   : > { %v919_v23 = vadd.f32 %v2074_v62, %v918_v30  ;;  %v1073_v62 = vpack.c.bf16 %v1435_v59, %v1433_v55  ;;  %v1046_v55 = vpack.c.bf16 %v1019_v5, %v1015_v21 }
 0x2c6   : > { %v920_v47 = vadd.f32 %v2078_v11, %v919_v23  ;;  %1103 = vmatpush2.bf16.msra.mxu0 %v1080_v27  ;;  %v2277_v11 = vpack.c.bf16 %v1931_v12, %v1926_v58  ;;  %v2281_v12 = vld [vmem:[#allocation8_spill] sm:$0xff]  ;;  %v1457_v23 = vld [vmem:[%s1519_s17 + $0x8] sm:$0xff] }
 0x2c7   : > { %1104 = vmatprep.subr.bf16.mxu0 %v1079_v37  ;;  %v1027_v37 = vpop.f32.mrf.mxu0  ;;  %v1068_v15 = vpack.c.bf16 %v2282_v6, %v2281_v12  ;;  %v1464_v6 = vld [vmem:[%s1519_s17 + $0x40] sm:$0xff] }
 0x2c8   : > { %v921_v50 = vadd.f32 %v1447_v56, %v920_v47 }
 0x2c9   : > { %v1029_v32 = vpop.f32.mrf.mxu0 }
 0x2ca   : > { %v922_v49 = vadd.f32 %v1449_v33, %v921_v50  ;;  %1105 = vmatpush2.bf16.msra.mxu0 %v2275_v51  ;;  %v1048_v20 = vpack.c.bf16 %v1029_v32, %v1025_v61  ;;  %v1458_v50 = vld [vmem:[%s1519_s17 + $0x10] sm:$0xff]  ;;  %v1459_v51 = vld [vmem:[%s1519_s17 + $0x18] sm:$0xff] }
 0x2cb   : > { %1106 = vmatprep.subr.bf16.mxu0 %v1077_v35  ;;  %v1031_v58 = vpop.f32.mrf.mxu0 }
 0x2cc   : > { %v923_v24 = vadd.f32 %v1439_v26, %v922_v49  ;;  %v1049_v19 = vpack.c.bf16 %v1031_v58, %v1027_v37 }
 0x2cd   : > { %v1035_v22 = vpop.f32.mrf.mxu0 }
 0x2ce   : > { %v924_v3 = vadd.f32 %v1441_v14, %v923_v24  ;;  %1107 = vmatpush2.bf16.msra.mxu0 %v2276_v39  ;;  %v890_v14 = vrot.slane %v889_v9, 2 }
 0x2cf   : > { %1108 = vmatprep.subr.bf16.mxu0 %v1075_v42  ;;  %v1037_v36 = vpop.f32.mrf.mxu0  ;;  %v1460_v42 = vld [vmem:[%s1519_s17 + $0x20] sm:$0xff] }
 0x2d0   : > { %v925_v26 = vrot.slane %v924_v3, 4  ;;  %v891_v31 = vadd.f32 %v890_v14, %v889_v9 }
 0x2d1   : > { %v1039_v59 = vpop.f32.mrf.mxu0 }
 0x2d2   : > { %1109 = vmatpush2.bf16.msra.mxu0 %v2277_v11  ;;  %v1050_v28 = vpack.c.bf16 %v1039_v59, %v1035_v22  ;;  %v926_v43 = vadd.f32 %v925_v26, %v924_v3  ;;  %v892_v16 = vrot.slane %v891_v31, 1  ;;  %v1461_v11 = vld [vmem:[%s1519_s17 + $0x28] sm:$0xff]  ;;  %v1468_v26 = vld [vmem:[%s1519_s17 + $0x60] sm:$0xff] }
 0x2d3   : > { %1110 = vmatprep.subr.bf16.mxu0 %v1073_v62  ;;  %v1041_v13 = vpop.f32.mrf.mxu0 }
 0x2d4   : > { %v1051_v52 = vpack.c.bf16 %v1041_v13, %v1037_v36  ;;  %v927_v1 = vrot.slane %v926_v43, 2  ;;  %v893_v56 = vadd.f32 %v892_v16, %v891_v31 }
 0x2d6   : > { %1111 = vmatpush2.bf16.msra.mxu0 %v1072_v0  ;;  %v928_v38 = vadd.f32 %v927_v1, %v926_v43  ;;  %1452 = vrcp.f32 %v893_v56  ;;  %v1469_v1 = vld [vmem:[%s1519_s17 + $0x68] sm:$0xff] }
 0x2d7   : > { %1112 = vmatprep.subr.bf16.mxu0 %v1071_v34  ;;  %v1462_v34 = vld [vmem:[%s1519_s17 + $0x30] sm:$0xff] }
 0x2d8   : > { %v929_v25 = vrot.slane %v928_v38, 1 }
 0x2da   : > { %1113 = vmatpush2.bf16.msra.mxu0 %v1070_v53  ;;  %v930_v48 = vadd.f32 %v929_v25, %v928_v38  ;;  %v1463_v53 = vld [vmem:[%s1519_s17 + $0x38] sm:$0xff]  ;;  %v1470_v25 = vld [vmem:[%s1519_s17 + $0x70] sm:$0xff] }
 0x2db   : > { %1114 = vmatprep.subr.bf16.mxu0 %v1069_v63 }
 0x2dc   : > { %1454 = vrcp.f32 %v930_v48 }
 0x2de   : > { %1115 = vmatpush2.bf16.msra.mxu0 %v1068_v15 }
 0x2e1   : > { %1117 = vmatmul.mubr.bf16.vlgmr.msra.gmra.mxu0 %v2285_v46 }
 0x2e2   : > { %1126 = vmatprep.mubr.bf16.mxu0 %v1047_v40 }
 0x2e3   : > { %v2147_v60 = vpop.eup %1452 }
 0x2e9   : > { %1127 = vmatmul.mubr.bf16.gmra.mxu0 %v1046_v55  ;;  %v2150_v8 = vpop.eup %1454 }
 0x2ea   : > { %1136 = vmatprep.mubr.bf16.mxu0 %v1049_v19  ;;  %v1466_v19 = vld [vmem:[%s1519_s17 + $0x50] sm:$0xff] }
 0x2f1   : > { %1137 = vmatmul.mubr.bf16.gmra.mxu0 %v1048_v20 }
 0x2f2   : > { %1146 = vmatprep.mubr.bf16.mxu0 %v1051_v52  ;;  %v1467_v52 = vld [vmem:[%s1519_s17 + $0x58] sm:$0xff] }
 0x2f9   : > { %1147 = vmatmul.mubr.bf16.gmra.mxu0 %v1050_v28 }
 0x3a1   : > { %v1118_v33 = vpop.f32.mrf.mxu0 }
 0x3a2   : > { %v1159_v4 = vmul.f32 %v2147_v60, %v1118_v33  ;;  %v1471_v33 = vld [vmem:[%s1519_s17 + $0x78] sm:$0xff] }
 0x3a3   : > { %v1120_v21 = vpop.f32.mrf.mxu0 }
 0x3a4   : > { %v1175_v10 = vadd.f32 %v1456_v41, %v1159_v4  ;;  %v1160_v30 = vmul.f32 %v2150_v8, %v1120_v21 }
 0x3a5   : > { %v1122_v45 = vpop.f32.mrf.mxu0 }
 0x3a6   : > { %1191 = vst [vmem:[%s2157_s9] sm:$0xff] %v1175_v10  ;;  %v1176_v44 = vadd.f32 %v1457_v23, %v1160_v30  ;;  %v1161_v27 = vmul.f32 %v2147_v60, %v1122_v45 }
 0x3a7   : > { %v1124_v47 = vpop.f32.mrf.mxu0 }
 0x3a8   : > { %1192 = vst [vmem:[%s2157_s9 + $0x8] sm:$0xff] %v1176_v44  ;;  %v1177_v5 = vadd.f32 %v1458_v50, %v1161_v27  ;;  %v1162_v49 = vmul.f32 %v2150_v8, %v1124_v47 }
 0x3a9   : > { %v1128_v35 = vpop.f32.mrf.mxu0 }
 0x3aa   : > { %1193 = vst [vmem:[%s2157_s9 + $0x10] sm:$0xff] %v1177_v5  ;;  %v1178_v24 = vadd.f32 %v1459_v51, %v1162_v49  ;;  %v1163_v29 = vmul.f32 %v2147_v60, %v1128_v35 }
 0x3ab   : > { %v1130_v3 = vpop.f32.mrf.mxu0 }
 0x3ac   : > { %1194 = vst [vmem:[%s2157_s9 + $0x18] sm:$0xff] %v1178_v24  ;;  %v1179_v39 = vadd.f32 %v1460_v42, %v1163_v29  ;;  %v1164_v61 = vmul.f32 %v2150_v8, %v1130_v3 }
 0x3ad   : > { %v1132_v62 = vpop.f32.mrf.mxu0 }
 0x3ae   : > { %1195 = vst [vmem:[%s2157_s9 + $0x20] sm:$0xff] %v1179_v39  ;;  %v1180_v37 = vadd.f32 %v1461_v11, %v1164_v61  ;;  %v1165_v7 = vmul.f32 %v2147_v60, %v1132_v62 }
 0x3af   : > { %v1134_v0 = vpop.f32.mrf.mxu0 }
 0x3b0   : > { %1196 = vst [vmem:[%s2157_s9 + $0x28] sm:$0xff] %v1180_v37  ;;  %v1181_v32 = vadd.f32 %v1462_v34, %v1165_v7  ;;  %v1166_v17 = vmul.f32 %v2150_v8, %v1134_v0 }
 0x3b1   : > { %v1138_v2 = vpop.f32.mrf.mxu0 }
 0x3b2   : > { %1197 = vst [vmem:[%s2157_s9 + $0x30] sm:$0xff] %v1181_v32  ;;  %v1182_v63 = vadd.f32 %v1463_v53, %v1166_v17  ;;  %v1167_v58 = vmul.f32 %v2147_v60, %v1138_v2 }
 0x3b3   : > { %v1140_v12 = vpop.f32.mrf.mxu0 }
 0x3b4   : > { %1198 = vst [vmem:[%s2157_s9 + $0x38] sm:$0xff] %v1182_v63  ;;  %v1183_v15 = vadd.f32 %v1464_v6, %v1167_v58  ;;  %v1168_v40 = vmul.f32 %v2150_v8, %v1140_v12 }
 0x3b5   : > { %v1142_v22 = vpop.f32.mrf.mxu0 }
 0x3b6   : > { %1199 = vst [vmem:[%s2157_s9 + $0x40] sm:$0xff] %v1183_v15  ;;  %v1184_v18 = vadd.f32 %v1465_v54, %v1168_v40  ;;  %v1169_v46 = vmul.f32 %v2147_v60, %v1142_v22 }
 0x3b7   : > { %v1144_v36 = vpop.f32.mrf.mxu0 }
 0x3b8   : > { %1200 = vst [vmem:[%s2157_s9 + $0x48] sm:$0xff] %v1184_v18  ;;  %v1185_v55 = vadd.f32 %v1466_v19, %v1169_v46  ;;  %v1170_v59 = vmul.f32 %v2150_v8, %v1144_v36 }
 0x3b9   : > { %v1148_v13 = vpop.f32.mrf.mxu0 }
 0x3ba   : > { %1201 = vst [vmem:[%s2157_s9 + $0x50] sm:$0xff] %v1185_v55  ;;  %v1186_v20 = vadd.f32 %v1467_v52, %v1170_v59  ;;  %v1171_v28 = vmul.f32 %v2147_v60, %v1148_v13 }
 0x3bb   : > { %v1150_v57 = vpop.f32.mrf.mxu0 }
 0x3bc   : > { %1202 = vst [vmem:[%s2157_s9 + $0x58] sm:$0xff] %v1186_v20  ;;  %v1187_v9 = vadd.f32 %v1468_v26, %v1171_v28  ;;  %v1172_v43 = vmul.f32 %v2150_v8, %v1150_v57 }
 0x3bd   : > { %v1152_v14 = vpop.f32.mrf.mxu0 }
 0x3be   : > { %1203 = vst [vmem:[%s2157_s9 + $0x60] sm:$0xff] %v1187_v9  ;;  %v1188_v31 = vadd.f32 %v1469_v1, %v1172_v43  ;;  %v1173_v38 = vmul.f32 %v2147_v60, %v1152_v14 }
 0x3bf   : > { %v1154_v16 = vpop.f32.mrf.mxu0 }
 0x3c0   : > { %1204 = vst [vmem:[%s2157_s9 + $0x68] sm:$0xff] %v1188_v31  ;;  %v1189_v56 = vadd.f32 %v1470_v25, %v1173_v38  ;;  %v1174_v48 = vmul.f32 %v2150_v8, %v1154_v16 }
 0x3c2   : > { %1205 = vst [vmem:[%s2157_s9 + $0x70] sm:$0xff] %v1189_v56  ;;  %v1190_v4 = vadd.f32 %v1471_v33, %v1174_v48 }
 0x3c4   : > { %1206 = vst [vmem:[%s2157_s9 + $0x78] sm:$0xff] %v1190_v4 }
 0x3c5 PF: > { %s13_s12 = sadd.s32 1, %s1478_s12  }
 0x3c6   : > { %p10_p4 = scmp.ge.s32.totalorder %s13_s12, 4  }
 0x3c8   :  { %12 = sbr.rel (!%p10_p4) target bundleno = 1 (0x1), region = 62 }

</bundles_post_ra>
